<compile_context>
chip_gen: v5e
topology: v5e:2x2
jax: 0.10.0
libtpu: 0.0.40
codegen_flags: <defaults>
</compile_context>

<pallas_src>
import jax
import jax.numpy as jnp
from jax.experimental import pallas as pl
from jax.experimental.pallas import tpu as pltpu


def _round_up(x, m):
    return ((x + m - 1) // m) * m


def _pad_last(x, new_last):
    if new_last == x.shape[-1]:
        return x
    pads = [(0, 0)] * (x.ndim - 1) + [(0, new_last - x.shape[-1])]
    return jnp.pad(x, pads)


def _pick_block_dim(d, max_inflation=1.25):
    """Pad `d` up to a multiple of 128 only when it is cheap; otherwise keep the full
    (unpadded) dim as the block dim (legal when block dim == array dim), avoiding an
    extra HBM pad pass and inflated steady-state DMA traffic."""
    if d % 128 == 0:
        return d
    p = _round_up(d, 128)
    return p if p <= d * max_inflation else d


def _device_info():
    """(vmem_capacity_bytes, tensorcores_per_chip) with safe fallbacks."""
    kind = ""
    try:
        kind = jax.devices()[0].device_kind.lower().replace(" ", "")
    except Exception:
        pass
    is_v7 = ("v7" in kind) or ("7x" in kind)
    try:
        vmem_cap = int(pltpu.get_tpu_info().vmem_capacity_bytes)
    except Exception:
        vmem_cap = (64 << 20) if is_v7 else (128 << 20)
    num_tc = 2 if (is_v7 or "v4" in kind or "v5p" in kind) else 1
    return vmem_cap, num_tc


def _decoder_kernel(enc_ref, norm_ref, mask_ref, wt_ref, out_ref):
    # enc_ref / norm_ref : [tile_m, Nb]
    # mask_ref           : [tile_m*C, Nb]  row r -> (m = r // C, source c = r % C)
    # wt_ref             : [Nb, Lb]        resident, pre-transposed Linear weight
    # out_ref            : [tile_m*C, Lb]
    tile_m, n = enc_ref.shape
    rows = mask_ref.shape[0]
    c = rows // tile_m

    # Elementwise masking in f32 (matches the PyTorch f32 reference even when the
    # HBM/DMA dtype is bf16; avoids bf16 VPU ops on v5e).
    en = enc_ref[...].astype(jnp.float32) * norm_ref[...].astype(jnp.float32)
    mask = mask_ref[...].astype(jnp.float32).reshape(tile_m, c, n)
    # TODO(synk): for large C, audit this size-C sublane-interleave broadcast with
    # pl.lower_as_mlir; for TasNet-like C<=4 it stays hidden under the mask DMA.
    masked = (en[:, None, :] * mask).reshape(rows, n)

    # Single flattened 2-D MXU matmul, f32 accumulation; operands in storage dtype.
    out = jnp.dot(masked.astype(wt_ref.dtype), wt_ref[...],
                  preferred_element_type=jnp.float32)
    out_ref[...] = out.astype(out_ref.dtype)


def decoder_forward(normalization, encoded, rnn_mask, weight, *, max_tile_m=1024):
    """normalization/encoded: [B,K,N]; rnn_mask: [B,K,C,N]; weight: [L,N] -> [B,K,C,L]."""
    B, K, N = encoded.shape
    _, _, C, _ = rnn_mask.shape
    L = weight.shape[0]
    M = B * K

    n_b = _pick_block_dim(N)
    l_b = _pick_block_dim(L)
    itemsize = jnp.dtype(encoded.dtype).itemsize
    out_dtype = encoded.dtype

    # ---- VMEM accounting per (b,k) row, incl. kernel f32 temporaries -----------------
    per_row_bytes = (
        2 * itemsize * (2 * n_b)              # enc + norm blocks   (x2 pipeline buffers)
        + 2 * itemsize * C * n_b              # mask block          (x2 pipeline buffers)
        + 2 * itemsize * C * l_b              # output block        (x2 pipeline buffers)
        + 4 * (n_b + 2 * C * n_b + C * l_b)   # f32 temps: en, mask/masked slab, f32 out
    )
    weight_bytes = 2 * n_b * l_b * itemsize   # conservative: assume double-buffered

    vmem_cap, num_tc = _device_info()
    hard_cap = max(16 << 20, vmem_cap - (8 << 20))   # v7x: ~56 MiB; v5e/v6e: ~120 MiB
    target = min(48 << 20, hard_cap)                 # tile budget (raised vs 12 MiB)
    headroom = 2 << 20

    block_budget = max(per_row_bytes, target - weight_bytes - headroom)
    tile_m = max(8, min(max_tile_m, (block_budget // per_row_bytes) // 8 * 8))
    tile_m = min(tile_m, _round_up(M, 8))
    # Dual-TC chips: ensure >= 2 pipelined grid steps per core; don't shrink on 1-TC chips.
    if num_tc >= 2 and tile_m > 8:
        min_steps = 2 * num_tc
        if -(-M // tile_m) < min_steps:
            tile_m = max(8, _round_up(-(-M // min_steps), 8))
    grid_m = -(-M // tile_m)   # ragged last block handled by Pallas; no M padding pass

    vmem_needed = tile_m * per_row_bytes + weight_bytes + headroom
    vmem_limit = int(min(hard_cap, max(vmem_needed, 24 << 20)))

    # ---- layout-only reshapes; pad N / L only when _pick_block_dim chose to ----------
    enc2 = _pad_last(encoded.reshape(M, N), n_b)
    norm2 = _pad_last(normalization.reshape(M, N), n_b)
    mask2 = _pad_last(rnn_mask.reshape(M * C, N), n_b)
    wt = weight.T                                        # [N, L], transposed once
    if wt.shape != (n_b, l_b):
        wt = jnp.pad(wt, ((0, n_b - N), (0, l_b - L)))

    cost = pl.CostEstimate(
        flops=2 * M * C * N * L,
        transcendentals=0,
        bytes_accessed=(encoded.size + normalization.size + rnn_mask.size
                        + weight.size) * itemsize
                       + M * C * L * jnp.dtype(out_dtype).itemsize)

    def _run(single_buffer_weight):
        if single_buffer_weight:
            wt_spec = pl.BlockSpec((n_b, l_b), lambda i: (0, 0),
                                   pipeline_mode=pl.Buffered(1))
        else:
            wt_spec = pl.BlockSpec((n_b, l_b), lambda i: (0, 0))
        return pl.pallas_call(
            _decoder_kernel,
            out_shape=jax.ShapeDtypeStruct((M * C, l_b), out_dtype),
            grid_spec=pltpu.PrefetchScalarGridSpec(
                num_scalar_prefetch=0,
                grid=(grid_m,),
                in_specs=[
                    pl.BlockSpec((tile_m, n_b), lambda i: (i, 0)),
                    pl.BlockSpec((tile_m, n_b), lambda i: (i, 0)),
                    pl.BlockSpec((tile_m * C, n_b), lambda i: (i, 0)),
                    wt_spec,                               # resident weight
                ],
                out_specs=pl.BlockSpec((tile_m * C, l_b), lambda i: (i, 0)),
            ),
            compiler_params=pltpu.CompilerParams(
                dimension_semantics=("parallel",),
                vmem_limit_bytes=vmem_limit),
            cost_estimate=cost,
        )(enc2, norm2, mask2, wt)

    try:
        # Single-buffer the constant-index weight to free VMEM for larger row tiles.
        out2 = _run(single_buffer_weight=True)
    except Exception:
        # Fall back to the default (double-buffered) spec on jax versions where
        # pipeline_mode / Buffered(1) is not supported.
        out2 = _run(single_buffer_weight=False)

    out = out2.reshape(M, C, l_b)
    if l_b != L:
        out = out[:, :, :L]
    return out.reshape(B, K, C, L)


if __name__ == "__main__":
    # Small shapes consistent with the module's forward.
    B, K, C = 2, 8, 2          # batch, segments, sources
    N = 32                     # input_dim  (basis dimension)
    L = 16                     # output_dim

    key = jax.random.PRNGKey(0)
    k_enc, k_norm, k_mask, k_w = jax.random.split(key, 4)

    encoded = jax.random.normal(k_enc, (B, K, N), dtype=jnp.float32)
    normalization = jax.random.normal(k_norm, (B, K, N), dtype=jnp.float32)
    rnn_mask = jax.random.uniform(k_mask, (B, K, C, N), dtype=jnp.float32)

    # nn.Linear(input_dim, output_dim, bias=False): weight [L, N] ~ U(-1/sqrt(N), 1/sqrt(N)).
    bound = 1.0 / jnp.sqrt(jnp.float32(N))
    weight = jax.random.uniform(k_w, (L, N), dtype=jnp.float32,
                                minval=-bound, maxval=bound)

    # Pure-JAX reference.
    masked_ref = encoded[:, :, None, :] * normalization[:, :, None, :] * rnn_mask
    ref = jnp.einsum("bkcn,ln->bkcl", masked_ref, weight)

    # f32 path: exact vs the PyTorch f32 reference.
    out = jax.block_until_ready(decoder_forward(normalization, encoded, rnn_mask, weight))
    assert out.shape == (B, K, C, L)
    assert jnp.allclose(out, ref, atol=1e-5, rtol=1e-5)

    # bf16 HBM/DMA path: halves memory traffic; f32 elementwise + f32 MXU accumulation
    # in-kernel, so only bf16 storage rounding remains (loose tolerance).
    to_bf16 = lambda x: x.astype(jnp.bfloat16)
    out_bf16 = jax.block_until_ready(
        decoder_forward(to_bf16(normalization), to_bf16(encoded),
                        to_bf16(rnn_mask), to_bf16(weight)))
    assert out_bf16.shape == (B, K, C, L)
    assert jnp.allclose(out_bf16.astype(jnp.float32), ref, atol=5e-2, rtol=5e-2)

    print("KERNEL_OK")
</pallas_src>

<mosaic_0001>
module attributes {stable_mosaic.version = 11 : i64} {
  func.func @_decoder_kernel(%arg0: i32, %arg1: memref<16x32xf32, #tpu.memory_space<vmem>>, %arg2: memref<16x32xf32, #tpu.memory_space<vmem>>, %arg3: memref<32x32xf32, #tpu.memory_space<vmem>>, %arg4: memref<32x16xf32, #tpu.memory_space<vmem>>, %arg5: memref<32x16xf32, #tpu.memory_space<vmem>>) attributes {dimension_semantics = [#tpu.dimension_semantics<parallel>], iteration_bounds = array<i64: 1>, scalar_prefetch = 0 : i64, scratch_operands = 0 : i64, tpu.core_type = #tpu.core_type<tc>, window_params = [{transform_indices = @transform_0, window_bounds = array<i64: 16, 32>}, {transform_indices = @transform_1, window_bounds = array<i64: 16, 32>}, {transform_indices = @transform_2, window_bounds = array<i64: 32, 32>}, {pipeline_mode = #tpu.pipeline_mode<synchronous>, transform_indices = @transform_3, window_bounds = array<i64: 32, 16>}, {transform_indices = @transform_4, window_bounds = array<i64: 32, 16>}]} {
    %c0 = arith.constant 0 : index
    %c0_0 = arith.constant 0 : index
    %0 = vector.load %arg1[%c0, %c0_0] : memref<16x32xf32, #tpu.memory_space<vmem>>, vector<16x32xf32>
    %c0_1 = arith.constant 0 : index
    %c0_2 = arith.constant 0 : index
    %1 = vector.load %arg2[%c0_1, %c0_2] : memref<16x32xf32, #tpu.memory_space<vmem>>, vector<16x32xf32>
    %2 = arith.mulf %0, %1 : vector<16x32xf32>
    %c0_3 = arith.constant 0 : index
    %c0_4 = arith.constant 0 : index
    %3 = vector.load %arg3[%c0_3, %c0_4] : memref<32x32xf32, #tpu.memory_space<vmem>>, vector<32x32xf32>
    %4 = vector.shape_cast %3 : vector<32x32xf32> to vector<16x2x32xf32>
    %5 = vector.shape_cast %2 : vector<16x32xf32> to vector<16x1x32xf32>
    %6 = vector.broadcast %5 : vector<16x1x32xf32> to vector<16x2x32xf32>
    %7 = arith.mulf %6, %4 : vector<16x2x32xf32>
    %8 = vector.shape_cast %7 : vector<16x2x32xf32> to vector<32x32xf32>
    %c0_5 = arith.constant 0 : index
    %c0_6 = arith.constant 0 : index
    %9 = vector.load %arg4[%c0_5, %c0_6] : memref<32x16xf32, #tpu.memory_space<vmem>>, vector<32x16xf32>
    %cst = arith.constant dense<0.000000e+00> : vector<32x16xf32>
    %10 = tpu.matmul %8, %9, %cst {dimension_numbers = #tpu.dot_dimension_numbers<[1], [0], [0], [1], [0, 0, 1, 1], [], []>} : vector<32x32xf32>, vector<32x16xf32>, vector<32x16xf32> -> vector<32x16xf32>
    %c0_7 = arith.constant 0 : index
    %c0_8 = arith.constant 0 : index
    %11 = vector.load %arg5[%c0_7, %c0_8] : memref<32x16xf32, #tpu.memory_space<vmem>>, vector<32x16xf32>
    tpu.vector_store %arg5[%c0_7, %c0_8], %10 {strides = array<i32>} : memref<32x16xf32, #tpu.memory_space<vmem>>, vector<32x16xf32>,
    return
  }
  func.func @transform_0(%arg0: i32) -> (i32, i32) {
    %c0_i32 = arith.constant 0 : i32
    %c0_i32_0 = arith.constant 0 : i32
    return %arg0, %c0_i32 : i32, i32
  }
  func.func @transform_1(%arg0: i32) -> (i32, i32) {
    %c0_i32 = arith.constant 0 : i32
    %c0_i32_0 = arith.constant 0 : i32
    return %arg0, %c0_i32 : i32, i32
  }
  func.func @transform_2(%arg0: i32) -> (i32, i32) {
    %c0_i32 = arith.constant 0 : i32
    %c0_i32_0 = arith.constant 0 : i32
    return %arg0, %c0_i32 : i32, i32
  }
  func.func @transform_3(%arg0: i32) -> (i32, i32) {
    %c0_i32 = arith.constant 0 : i32
    %c0_i32_0 = arith.constant 0 : i32
    %c0_i32_1 = arith.constant 0 : i32
    return %c0_i32, %c0_i32_0 : i32, i32
  }
  func.func @transform_4(%arg0: i32) -> (i32, i32) {
    %c0_i32 = arith.constant 0 : i32
    %c0_i32_0 = arith.constant 0 : i32
    return %arg0, %c0_i32 : i32, i32
  }
}

module attributes {stable_mosaic.version = 11 : i64} {
  func.func @_decoder_kernel(%arg0: i32, %arg1: memref<16x32xf32, #tpu.memory_space<vmem>>, %arg2: memref<16x32xf32, #tpu.memory_space<vmem>>, %arg3: memref<32x32xf32, #tpu.memory_space<vmem>>, %arg4: memref<32x16xf32, #tpu.memory_space<vmem>>, %arg5: memref<32x16xf32, #tpu.memory_space<vmem>>) attributes {dimension_semantics = [#tpu.dimension_semantics<parallel>], iteration_bounds = array<i64: 1>, scalar_prefetch = 0 : i64, scratch_operands = 0 : i64, tpu.core_type = #tpu.core_type<tc>, window_params = [{transform_indices = @transform_0, window_bounds = array<i64: 16, 32>}, {transform_indices = @transform_1, window_bounds = array<i64: 16, 32>}, {transform_indices = @transform_2, window_bounds = array<i64: 32, 32>}, {pipeline_mode = #tpu.pipeline_mode<synchronous>, transform_indices = @transform_3, window_bounds = array<i64: 32, 16>}, {transform_indices = @transform_4, window_bounds = array<i64: 32, 16>}]} {
    %c0 = arith.constant 0 : index
    %c0_0 = arith.constant 0 : index
    %0 = vector.load %arg1[%c0, %c0_0] : memref<16x32xf32, #tpu.memory_space<vmem>>, vector<16x32xf32>
    %c0_1 = arith.constant 0 : index
    %c0_2 = arith.constant 0 : index
    %1 = vector.load %arg2[%c0_1, %c0_2] : memref<16x32xf32, #tpu.memory_space<vmem>>, vector<16x32xf32>
    %2 = arith.mulf %0, %1 : vector<16x32xf32>
    %c0_3 = arith.constant 0 : index
    %c0_4 = arith.constant 0 : index
    %3 = vector.load %arg3[%c0_3, %c0_4] : memref<32x32xf32, #tpu.memory_space<vmem>>, vector<32x32xf32>
    %4 = vector.shape_cast %3 : vector<32x32xf32> to vector<16x2x32xf32>
    %5 = vector.shape_cast %2 : vector<16x32xf32> to vector<16x1x32xf32>
    %6 = vector.broadcast %5 : vector<16x1x32xf32> to vector<16x2x32xf32>
    %7 = arith.mulf %6, %4 : vector<16x2x32xf32>
    %8 = vector.shape_cast %7 : vector<16x2x32xf32> to vector<32x32xf32>
    %c0_5 = arith.constant 0 : index
    %c0_6 = arith.constant 0 : index
    %9 = vector.load %arg4[%c0_5, %c0_6] : memref<32x16xf32, #tpu.memory_space<vmem>>, vector<32x16xf32>
    %cst = arith.constant dense<0.000000e+00> : vector<32x16xf32>
    %10 = tpu.matmul %8, %9, %cst {dimension_numbers = #tpu.dot_dimension_numbers<[1], [0], [0], [1], [0, 0, 1, 1], [], []>} : vector<32x32xf32>, vector<32x16xf32>, vector<32x16xf32> -> vector<32x16xf32>
    %c0_7 = arith.constant 0 : index
    %c0_8 = arith.constant 0 : index
    %11 = vector.load %arg5[%c0_7, %c0_8] : memref<32x16xf32, #tpu.memory_space<vmem>>, vector<32x16xf32>
    tpu.vector_store %arg5[%c0_7, %c0_8], %10 {strides = array<i32>} : memref<32x16xf32, #tpu.memory_space<vmem>>, vector<32x16xf32>,
    return
  }
  func.func @transform_0(%arg0: i32) -> (i32, i32) {
    %c0_i32 = arith.constant 0 : i32
    %c0_i32_0 = arith.constant 0 : i32
    return %arg0, %c0_i32 : i32, i32
  }
  func.func @transform_1(%arg0: i32) -> (i32, i32) {
    %c0_i32 = arith.constant 0 : i32
    %c0_i32_0 = arith.constant 0 : i32
    return %arg0, %c0_i32 : i32, i32
  }
  func.func @transform_2(%arg0: i32) -> (i32, i32) {
    %c0_i32 = arith.constant 0 : i32
    %c0_i32_0 = arith.constant 0 : i32
    return %arg0, %c0_i32 : i32, i32
  }
  func.func @transform_3(%arg0: i32) -> (i32, i32) {
    %c0_i32 = arith.constant 0 : i32
    %c0_i32_0 = arith.constant 0 : i32
    %c0_i32_1 = arith.constant 0 : i32
    return %c0_i32, %c0_i32_0 : i32, i32
  }
  func.func @transform_4(%arg0: i32) -> (i32, i32) {
    %c0_i32 = arith.constant 0 : i32
    %c0_i32_0 = arith.constant 0 : i32
    return %arg0, %c0_i32 : i32, i32
  }
}

</mosaic_0001>

<bundles_post_ra>
// kernel: tpu_custom_call.1
= control target key start
LH: loop header
LB: loop body
LE: loop exit
PB: predicated region body
PF: predicated region fallthrough
CT: control target
= control target key end

     0   :  { %9 = vsyncpa [#allocation3], 0  ;;  %s275_s18 = smov [#allocation2]   ;;  %s276_s20 = smov 128   ;;  %s362_s0 = inlined_call_operand.vmem [shape: f32[16,32], index: 0, kind: input, shape index: {}]   ;;  %s363_s1 = inlined_call_operand.hbm [shape: f32[16,32], index: 1, kind: input, shape index: {}]   ;;  %s364_s2 = inlined_call_operand.vmem [shape: f32[32,32], index: 2, kind: input, shape index: {}]   ;;  %s365_s3 = inlined_call_operand.vmem [shape: f32[32,16], index: 3, kind: input, shape index: {}]   ;;  %s366_s4 = inlined_call_operand.vmem [shape: f32[32,16], index: 4, kind: output, shape index: {}]  }
   0x1   :  { %s16_s17 = sshll.u32 %s363_s1, 4  ;;  %s18_s19 = sshll.u32 %s275_s18, 4  ;;  %s17_s17 = int_to_ptr.hbm [resolvable:$true] %s16_s17  ;;  %s19_s19 = int_to_ptr.vmem [resolvable:$true] %s18_s19 }
   0x2   :  { %s277_s21 = smov 8  }
   0x3   :  { %24 = dma.hbm_to_vmem [thread:$0]  %s17_s17, 256, %s19_s19, [#allocation3], %s276_s20, %s276_s20, %s277_s21  }
   0x4   :  { %273 = dma.done.wait [#allocation3], 256  }
   0x5   :  { %274 = vsyncadd [#allocation3], 4294967040  ;;  %v138_v0 = vld [vmem:[%s365_s3 + $0x18] sm:$0xff]  ;;  %v137_v1 = vld [vmem:[%s365_s3 + $0x10] sm:$0xff]  ;;  %vm182_vm0 = vcmask 261120   ;;  %vm220_vm1 = vcmask 130048  }
   0x6   :  { %235 = vmatpush.msra.mxu2 %v138_v0  ;;  %236 = vmatpush.msra.mxu3 %v138_v0  ;;  %v33_v2 = vld [vmem:[%s362_s0] sm:$0xff]  ;;  %v136_v3 = vld [vmem:[%s365_s3 + $0x8] sm:$0xff]  ;;  %v36_v7 = vld [vmem:[#allocation2 + $0x8] sm:$0xff] }
   0x7   :  { %203 = vmatpush.msra.mxu0 %v138_v0  ;;  %234 = vmatpush.msra.mxu1 %v138_v0  ;;  %v35_v4 = vld [vmem:[#allocation2] sm:$0xff]  ;;  %v39_v5 = vld [vmem:[%s364_s2] sm:$0xff]  ;;  %v41_v26 = vld [vmem:[%s364_s2 + $0x10] sm:$0xff] }
   0x8   :  { %238 = vmatpush.msra.mxu2 %v137_v1  ;;  %239 = vmatpush.msra.mxu3 %v137_v1  ;;  %v34_v6 = vld [vmem:[%s362_s0 + $0x8] sm:$0xff]  ;;  %v37_v8 = vmul.f32 %v35_v4, %v33_v2  ;;  %v135_v9 = vld [vmem:[%s365_s3] sm:$0xff]  ;;  %v47_v10 = vrot.slane %v39_v5, 2  ;;  %v48_v11 = vrot.slane %v39_v5, 4  ;;  %v49_v12 = vrot.slane %v39_v5, 6  ;;  %v42_v59 = vld [vmem:[%s364_s2 + $0x18] sm:$0xff] }
   0x9   :  { %204 = vmatpush.msra.mxu0 %v137_v1  ;;  %237 = vmatpush.msra.mxu1 %v137_v1  ;;  %v327_v16 = vmul.f32 %v36_v7, %v34_v6  ;;  %v40_v22 = vld [vmem:[%s364_s2 + $0x8] sm:$0xff]  ;;  %v53_v35 = vrot.slane %v41_v26, 2  ;;  %v54_v42 = vrot.slane %v41_v26, 4  ;;  %v55_v43 = vrot.slane %v41_v26, 6 }
   0xa   :  { %241 = vmatpush.msra.mxu2 %v136_v3  ;;  %242 = vmatpush.msra.mxu3 %v136_v3  ;;  %v73_v13 = vrot.slane %v37_v8, 1  ;;  %v74_v14 = vrot.slane %v37_v8, 2  ;;  %v75_v15 = vrot.slane %v37_v8, 3  ;;  %v87_v17 = vperm.slane %v37_v8, 0 }
   0xb   :  { %205 = vmatpush.msra.mxu0 %v136_v3  ;;  %240 = vmatpush.msra.mxu1 %v136_v3  ;;  %v80_v27 = vrot.slane %v327_v16, 1  ;;  %v81_v28 = vrot.slane %v327_v16, 2  ;;  %v82_v29 = vrot.slane %v327_v16, 3  ;;  %v50_v30 = vrot.slane %v40_v22, 2 }
   0xc   :  { %244 = vmatpush.msra.mxu2 %v135_v9  ;;  %245 = vmatpush.msra.mxu3 %v135_v9  ;;  %v88_v18 = vperm.slane %v73_v13, 0  ;;  %v89_v19 = vperm.slane %v74_v14, 0  ;;  %v90_v20 = vperm.slane %v75_v15, 0  ;;  %v119_v21 = vmul.f32 %v87_v17, %v39_v5 }
   0xd   :  { %206 = vmatpush.msra.mxu0 %v135_v9  ;;  %243 = vmatpush.msra.mxu1 %v135_v9  ;;  %v51_v31 = vrot.slane %v40_v22, 4  ;;  %v76_v32 = vrot.slane %v37_v8, 4  ;;  %v77_v33 = vrot.slane %v37_v8, 5  ;;  %v78_v34 = vrot.slane %v37_v8, 6 }
   0xe   :  { %v120_v23 = vmul.f32 %v88_v18, %v47_v10  ;;  %v121_v24 = vmul.f32 %v89_v19, %v48_v11  ;;  %v122_v25 = vmul.f32 %v90_v20, %v49_v12  ;;  %155 = vst [vmem:[#allocation1] ss:$4 sm:$0xff] %v119_v21  ;;  %v95_v36 = vperm.slane %v327_v16, 0 }
   0xf   :  { %v79_v37 = vrot.slane %v37_v8, 7  ;;  %v96_v38 = vperm.slane %v80_v27, 0  ;;  %v91_v39 = vperm.slane %v76_v32, 0  ;;  %v92_v40 = vperm.slane %v77_v33, 0 }
  0x10   :  { %157 = vst [vmem:[#allocation1 + $0x1] ss:$4 sm:$0xff] %v120_v23  ;;  %v93_v41 = vperm.slane %v78_v34, 0  ;;  %v97_v44 = vperm.slane %v81_v28, 0  ;;  %v98_v45 = vperm.slane %v82_v29, 0  ;;  %v127_v49 = vmul.f32 %v95_v36, %v41_v26 }
  0x11   :  { %159 = vst [vmem:[#allocation1 + $0x2] ss:$4 sm:$0xff] %v121_v24  ;;  %v123_v46 = vmul.f32 %v91_v39, %v40_v22  ;;  %v124_v47 = vmul.f32 %v92_v40, %v50_v30  ;;  %v52_v50 = vrot.slane %v40_v22, 6  ;;  %v94_v51 = vperm.slane %v79_v37, 0 }
  0x12   :  { %161 = vst [vmem:[#allocation1 + $0x3] ss:$4 sm:$0xff] %v122_v25  ;;  %v125_v48 = vmul.f32 %v93_v41, %v51_v31  ;;  %v128_v52 = vmul.f32 %v96_v38, %v53_v35  ;;  %v129_v53 = vmul.f32 %v97_v44, %v54_v42  ;;  %v130_v54 = vmul.f32 %v98_v45, %v55_v43 }
  0x13   :  { %163 = vst [vmem:[#allocation1 + $0x20] ss:$4 sm:$0xff] %v123_v46  ;;  %v83_v56 = vrot.slane %v327_v16, 4  ;;  %v126_v57 = vmul.f32 %v94_v51, %v52_v50  ;;  %v84_v58 = vrot.slane %v327_v16, 5  ;;  %v85_v60 = vrot.slane %v327_v16, 6 }
  0x14   :  { %165 = vst [vmem:[#allocation1 + $0x21] ss:$4 sm:$0xff] %v124_v47  ;;  %v86_v61 = vrot.slane %v327_v16, 7  ;;  %v56_v63 = vrot.slane %v42_v59, 2  ;;  %v57_v1 = vrot.slane %v42_v59, 4  ;;  %v58_v3 = vrot.slane %v42_v59, 6 }
  0x15   :  { %167 = vst [vmem:[#allocation1 + $0x22] ss:$4 sm:$0xff] %v125_v48  ;;  %v99_v62 = vperm.slane %v83_v56, 0  ;;  %v100_v0 = vperm.slane %v84_v58, 0  ;;  %v101_v2 = vperm.slane %v85_v60, 0 }
  0x16   :  { %169 = vst [vmem:[#allocation1 + $0x23] ss:$4 sm:$0xff] %v126_v57  ;;  %v102_v4 = vperm.slane %v86_v61, 0 }
  0x17   :  { %v131_v5 = vmul.f32 %v99_v62, %v42_v59  ;;  %v132_v6 = vmul.f32 %v100_v0, %v56_v63  ;;  %v133_v8 = vmul.f32 %v101_v2, %v57_v1 }
  0x18   :  { %v134_v9 = vmul.f32 %v102_v4, %v58_v3 }
  0x19   :  { %v170_v55 = vld.sshfl [vmem:[#allocation1] sm:$0xff pattern:$0x73625140] }
  0x1a   :  { %172 = vst [vmem:[#allocation1] ss:$4 sm:$0xff] %v127_v49  ;;  %230 = vmatmul.msk.f32.vlgmr.msra.gmra.mxu0 %vm182_vm0, %v170_v55 }
  0x1b   :  { %173 = vst [vmem:[#allocation1 + $0x1] ss:$4 sm:$0xff] %v128_v52 }
  0x1c   :  { %174 = vst [vmem:[#allocation1 + $0x2] ss:$4 sm:$0xff] %v129_v53 }
  0x1d   :  { %175 = vst [vmem:[#allocation1 + $0x3] ss:$4 sm:$0xff] %v130_v54  ;;  %v171_v10 = vld.sshfl [vmem:[#allocation1 + $0x20] sm:$0xff pattern:$0x73625140] }
  0x1e   :  { %176 = vst [vmem:[#allocation1 + $0x20] ss:$4 sm:$0xff] %v131_v5  ;;  %231 = vmatmul.msk.f32.vlgmr.msra.gmra.mxu1 %vm182_vm0, %v171_v10 }
  0x1f   :  { %177 = vst [vmem:[#allocation1 + $0x21] ss:$4 sm:$0xff] %v132_v6 }
  0x20   :  { %178 = vst [vmem:[#allocation1 + $0x22] ss:$4 sm:$0xff] %v133_v8 }
  0x21   :  { %179 = vst [vmem:[#allocation1 + $0x23] ss:$4 sm:$0xff] %v134_v9 }
  0x24   :  { %v180_v7 = vld.sshfl [vmem:[#allocation1] sm:$0xff pattern:$0x73625140] }
  0x25   :  { %232 = vmatmul.msk.f32.vlgmr.msra.gmra.mxu2 %vm182_vm0, %v180_v7 }
  0x28   :  { %v181_v11 = vld.sshfl [vmem:[#allocation1 + $0x20] sm:$0xff pattern:$0x73625140] }
  0x29   :  { %233 = vmatmul.msk.f32.vlgmr.msra.gmra.mxu3 %vm182_vm0, %v181_v11 }
  0x97   :  { %v208_v12 = vpop.f32.mrf.mxu0 }
  0x98   :  { %221 = vst.msk [vmem:[%s366_s4] sm:$0xff] %vm220_vm1, %v208_v12 }
  0x9b   :  { %v211_v13 = vpop.f32.mrf.mxu1 }
  0x9c   :  { %222 = vst.msk [vmem:[%s366_s4 + $0x8] sm:$0xff] %vm220_vm1, %v211_v13 }
  0xa8   :  { %v214_v14 = vpop.f32.mrf.mxu2 }
  0xa9   :  { %223 = vst.msk [vmem:[%s366_s4 + $0x10] sm:$0xff] %vm220_vm1, %v214_v14 }
  0xac   :  { %v217_v15 = vpop.f32.mrf.mxu3 }
  0xad   :  { %224 = vst.msk [vmem:[%s366_s4 + $0x18] sm:$0xff] %vm220_vm1, %v217_v15 }
  0xae   :  { %229 = vsyncpa [#allocation3], 1 }

// kernel: tpu_custom_call.1
= control target key start
LH: loop header
LB: loop body
LE: loop exit
PB: predicated region body
PF: predicated region fallthrough
CT: control target
= control target key end

     0   :  { %9 = vsyncpa [#allocation3], 0  ;;  %s275_s18 = smov [#allocation2]   ;;  %s276_s20 = smov 128   ;;  %s362_s0 = inlined_call_operand.vmem [shape: f32[16,32], index: 0, kind: input, shape index: {}]   ;;  %s363_s1 = inlined_call_operand.hbm [shape: f32[16,32], index: 1, kind: input, shape index: {}]   ;;  %s364_s2 = inlined_call_operand.vmem [shape: f32[32,32], index: 2, kind: input, shape index: {}]   ;;  %s365_s3 = inlined_call_operand.vmem [shape: f32[32,16], index: 3, kind: input, shape index: {}]   ;;  %s366_s4 = inlined_call_operand.vmem [shape: f32[32,16], index: 4, kind: output, shape index: {}]  }
   0x1   :  { %s16_s17 = sshll.u32 %s363_s1, 4  ;;  %s18_s19 = sshll.u32 %s275_s18, 4  ;;  %s17_s17 = int_to_ptr.hbm [resolvable:$true] %s16_s17  ;;  %s19_s19 = int_to_ptr.vmem [resolvable:$true] %s18_s19 }
   0x2   :  { %s277_s21 = smov 8  }
   0x3   :  { %24 = dma.hbm_to_vmem [thread:$0]  %s17_s17, 256, %s19_s19, [#allocation3], %s276_s20, %s276_s20, %s277_s21  }
   0x4   :  { %273 = dma.done.wait [#allocation3], 256  }
   0x5   :  { %274 = vsyncadd [#allocation3], 4294967040  ;;  %v138_v0 = vld [vmem:[%s365_s3 + $0x18] sm:$0xff]  ;;  %v137_v1 = vld [vmem:[%s365_s3 + $0x10] sm:$0xff]  ;;  %vm182_vm0 = vcmask 261120   ;;  %vm220_vm1 = vcmask 130048  }
   0x6   :  { %235 = vmatpush.msra.mxu2 %v138_v0  ;;  %236 = vmatpush.msra.mxu3 %v138_v0  ;;  %v33_v2 = vld [vmem:[%s362_s0] sm:$0xff]  ;;  %v136_v3 = vld [vmem:[%s365_s3 + $0x8] sm:$0xff]  ;;  %v36_v7 = vld [vmem:[#allocation2 + $0x8] sm:$0xff] }
   0x7   :  { %203 = vmatpush.msra.mxu0 %v138_v0  ;;  %234 = vmatpush.msra.mxu1 %v138_v0  ;;  %v35_v4 = vld [vmem:[#allocation2] sm:$0xff]  ;;  %v39_v5 = vld [vmem:[%s364_s2] sm:$0xff]  ;;  %v41_v26 = vld [vmem:[%s364_s2 + $0x10] sm:$0xff] }
   0x8   :  { %238 = vmatpush.msra.mxu2 %v137_v1  ;;  %239 = vmatpush.msra.mxu3 %v137_v1  ;;  %v34_v6 = vld [vmem:[%s362_s0 + $0x8] sm:$0xff]  ;;  %v37_v8 = vmul.f32 %v35_v4, %v33_v2  ;;  %v135_v9 = vld [vmem:[%s365_s3] sm:$0xff]  ;;  %v47_v10 = vrot.slane %v39_v5, 2  ;;  %v48_v11 = vrot.slane %v39_v5, 4  ;;  %v49_v12 = vrot.slane %v39_v5, 6  ;;  %v42_v59 = vld [vmem:[%s364_s2 + $0x18] sm:$0xff] }
   0x9   :  { %204 = vmatpush.msra.mxu0 %v137_v1  ;;  %237 = vmatpush.msra.mxu1 %v137_v1  ;;  %v327_v16 = vmul.f32 %v36_v7, %v34_v6  ;;  %v40_v22 = vld [vmem:[%s364_s2 + $0x8] sm:$0xff]  ;;  %v53_v35 = vrot.slane %v41_v26, 2  ;;  %v54_v42 = vrot.slane %v41_v26, 4  ;;  %v55_v43 = vrot.slane %v41_v26, 6 }
   0xa   :  { %241 = vmatpush.msra.mxu2 %v136_v3  ;;  %242 = vmatpush.msra.mxu3 %v136_v3  ;;  %v73_v13 = vrot.slane %v37_v8, 1  ;;  %v74_v14 = vrot.slane %v37_v8, 2  ;;  %v75_v15 = vrot.slane %v37_v8, 3  ;;  %v87_v17 = vperm.slane %v37_v8, 0 }
   0xb   :  { %205 = vmatpush.msra.mxu0 %v136_v3  ;;  %240 = vmatpush.msra.mxu1 %v136_v3  ;;  %v80_v27 = vrot.slane %v327_v16, 1  ;;  %v81_v28 = vrot.slane %v327_v16, 2  ;;  %v82_v29 = vrot.slane %v327_v16, 3  ;;  %v50_v30 = vrot.slane %v40_v22, 2 }
   0xc   :  { %244 = vmatpush.msra.mxu2 %v135_v9  ;;  %245 = vmatpush.msra.mxu3 %v135_v9  ;;  %v88_v18 = vperm.slane %v73_v13, 0  ;;  %v89_v19 = vperm.slane %v74_v14, 0  ;;  %v90_v20 = vperm.slane %v75_v15, 0  ;;  %v119_v21 = vmul.f32 %v87_v17, %v39_v5 }
   0xd   :  { %206 = vmatpush.msra.mxu0 %v135_v9  ;;  %243 = vmatpush.msra.mxu1 %v135_v9  ;;  %v51_v31 = vrot.slane %v40_v22, 4  ;;  %v76_v32 = vrot.slane %v37_v8, 4  ;;  %v77_v33 = vrot.slane %v37_v8, 5  ;;  %v78_v34 = vrot.slane %v37_v8, 6 }
   0xe   :  { %v120_v23 = vmul.f32 %v88_v18, %v47_v10  ;;  %v121_v24 = vmul.f32 %v89_v19, %v48_v11  ;;  %v122_v25 = vmul.f32 %v90_v20, %v49_v12  ;;  %155 = vst [vmem:[#allocation1] ss:$4 sm:$0xff] %v119_v21  ;;  %v95_v36 = vperm.slane %v327_v16, 0 }
   0xf   :  { %v79_v37 = vrot.slane %v37_v8, 7  ;;  %v96_v38 = vperm.slane %v80_v27, 0  ;;  %v91_v39 = vperm.slane %v76_v32, 0  ;;  %v92_v40 = vperm.slane %v77_v33, 0 }
  0x10   :  { %157 = vst [vmem:[#allocation1 + $0x1] ss:$4 sm:$0xff] %v120_v23  ;;  %v93_v41 = vperm.slane %v78_v34, 0  ;;  %v97_v44 = vperm.slane %v81_v28, 0  ;;  %v98_v45 = vperm.slane %v82_v29, 0  ;;  %v127_v49 = vmul.f32 %v95_v36, %v41_v26 }
  0x11   :  { %159 = vst [vmem:[#allocation1 + $0x2] ss:$4 sm:$0xff] %v121_v24  ;;  %v123_v46 = vmul.f32 %v91_v39, %v40_v22  ;;  %v124_v47 = vmul.f32 %v92_v40, %v50_v30  ;;  %v52_v50 = vrot.slane %v40_v22, 6  ;;  %v94_v51 = vperm.slane %v79_v37, 0 }
  0x12   :  { %161 = vst [vmem:[#allocation1 + $0x3] ss:$4 sm:$0xff] %v122_v25  ;;  %v125_v48 = vmul.f32 %v93_v41, %v51_v31  ;;  %v128_v52 = vmul.f32 %v96_v38, %v53_v35  ;;  %v129_v53 = vmul.f32 %v97_v44, %v54_v42  ;;  %v130_v54 = vmul.f32 %v98_v45, %v55_v43 }
  0x13   :  { %163 = vst [vmem:[#allocation1 + $0x20] ss:$4 sm:$0xff] %v123_v46  ;;  %v83_v56 = vrot.slane %v327_v16, 4  ;;  %v126_v57 = vmul.f32 %v94_v51, %v52_v50  ;;  %v84_v58 = vrot.slane %v327_v16, 5  ;;  %v85_v60 = vrot.slane %v327_v16, 6 }
  0x14   :  { %165 = vst [vmem:[#allocation1 + $0x21] ss:$4 sm:$0xff] %v124_v47  ;;  %v86_v61 = vrot.slane %v327_v16, 7  ;;  %v56_v63 = vrot.slane %v42_v59, 2  ;;  %v57_v1 = vrot.slane %v42_v59, 4  ;;  %v58_v3 = vrot.slane %v42_v59, 6 }
  0x15   :  { %167 = vst [vmem:[#allocation1 + $0x22] ss:$4 sm:$0xff] %v125_v48  ;;  %v99_v62 = vperm.slane %v83_v56, 0  ;;  %v100_v0 = vperm.slane %v84_v58, 0  ;;  %v101_v2 = vperm.slane %v85_v60, 0 }
  0x16   :  { %169 = vst [vmem:[#allocation1 + $0x23] ss:$4 sm:$0xff] %v126_v57  ;;  %v102_v4 = vperm.slane %v86_v61, 0 }
  0x17   :  { %v131_v5 = vmul.f32 %v99_v62, %v42_v59  ;;  %v132_v6 = vmul.f32 %v100_v0, %v56_v63  ;;  %v133_v8 = vmul.f32 %v101_v2, %v57_v1 }
  0x18   :  { %v134_v9 = vmul.f32 %v102_v4, %v58_v3 }
  0x19   :  { %v170_v55 = vld.sshfl [vmem:[#allocation1] sm:$0xff pattern:$0x73625140] }
  0x1a   :  { %172 = vst [vmem:[#allocation1] ss:$4 sm:$0xff] %v127_v49  ;;  %230 = vmatmul.msk.f32.vlgmr.msra.gmra.mxu0 %vm182_vm0, %v170_v55 }
  0x1b   :  { %173 = vst [vmem:[#allocation1 + $0x1] ss:$4 sm:$0xff] %v128_v52 }
  0x1c   :  { %174 = vst [vmem:[#allocation1 + $0x2] ss:$4 sm:$0xff] %v129_v53 }
  0x1d   :  { %175 = vst [vmem:[#allocation1 + $0x3] ss:$4 sm:$0xff] %v130_v54  ;;  %v171_v10 = vld.sshfl [vmem:[#allocation1 + $0x20] sm:$0xff pattern:$0x73625140] }
  0x1e   :  { %176 = vst [vmem:[#allocation1 + $0x20] ss:$4 sm:$0xff] %v131_v5  ;;  %231 = vmatmul.msk.f32.vlgmr.msra.gmra.mxu1 %vm182_vm0, %v171_v10 }
  0x1f   :  { %177 = vst [vmem:[#allocation1 + $0x21] ss:$4 sm:$0xff] %v132_v6 }
  0x20   :  { %178 = vst [vmem:[#allocation1 + $0x22] ss:$4 sm:$0xff] %v133_v8 }
  0x21   :  { %179 = vst [vmem:[#allocation1 + $0x23] ss:$4 sm:$0xff] %v134_v9 }
  0x24   :  { %v180_v7 = vld.sshfl [vmem:[#allocation1] sm:$0xff pattern:$0x73625140] }
  0x25   :  { %232 = vmatmul.msk.f32.vlgmr.msra.gmra.mxu2 %vm182_vm0, %v180_v7 }
  0x28   :  { %v181_v11 = vld.sshfl [vmem:[#allocation1 + $0x20] sm:$0xff pattern:$0x73625140] }
  0x29   :  { %233 = vmatmul.msk.f32.vlgmr.msra.gmra.mxu3 %vm182_vm0, %v181_v11 }
  0x97   :  { %v208_v12 = vpop.f32.mrf.mxu0 }
  0x98   :  { %221 = vst.msk [vmem:[%s366_s4] sm:$0xff] %vm220_vm1, %v208_v12 }
  0x9b   :  { %v211_v13 = vpop.f32.mrf.mxu1 }
  0x9c   :  { %222 = vst.msk [vmem:[%s366_s4 + $0x8] sm:$0xff] %vm220_vm1, %v211_v13 }
  0xa8   :  { %v214_v14 = vpop.f32.mrf.mxu2 }
  0xa9   :  { %223 = vst.msk [vmem:[%s366_s4 + $0x10] sm:$0xff] %vm220_vm1, %v214_v14 }
  0xac   :  { %v217_v15 = vpop.f32.mrf.mxu3 }
  0xad   :  { %224 = vst.msk [vmem:[%s366_s4 + $0x18] sm:$0xff] %vm220_vm1, %v217_v15 }
  0xae   :  { %229 = vsyncpa [#allocation3], 1 }

</bundles_post_ra>
